<compile_context>
chip_gen: v7x
topology: tpu7x:2x2x1
jax: 0.10.0
libtpu: 0.0.40
codegen_flags: <defaults>
</compile_context>

<pallas_src>
import functools
import numpy as np
import jax
import jax.numpy as jnp
from jax.experimental import pallas as pl
from jax.experimental.pallas import tpu as pltpu

NEG_SLOPE = 0.01   # nn.LeakyReLU default
BN_EPS = 1e-5      # nn.BatchNorm1d default
LANE = 128         # lane-dense feature padding


# ------------------------------ Pallas kernels ------------------------------

def _bn_concat_linear_kernel(x_ref, g_ref, bt_ref, w_ref, b_ref, o_ref, *, n_slabs):
    """Fused BatchNorm (per slab) -> concat -> Linear -> LeakyReLU.

    x_ref: (F, M, D)  g_ref/bt_ref: (F, 1, D)  w_ref: (F, D, HP)  b_ref: (1, HP)
    The concat-matmul is expressed as a sum of per-slab matmuls (identical math,
    no in-register lane concat needed).
    """
    acc = jnp.zeros(o_ref.shape, jnp.float32) + b_ref[...]
    for f in range(n_slabs):
        x = x_ref[f]                                           # (M, D)
        mean = jnp.mean(x, axis=0, keepdims=True)
        var = jnp.mean((x - mean) ** 2, axis=0, keepdims=True)  # biased (train mode)
        xn = (x - mean) * jax.lax.rsqrt(var + BN_EPS)
        xn = xn * g_ref[f] + bt_ref[f]
        acc = acc + jnp.dot(xn, w_ref[f], preferred_element_type=jnp.float32)
    o_ref[...] = jnp.where(acc > 0, acc, NEG_SLOPE * acc)


def _linear_kernel(x_ref, w_ref, b_ref, o_ref, *, leaky):
    y = jnp.dot(x_ref[...], w_ref[...], preferred_element_type=jnp.float32)
    y = y + b_ref[...]
    if leaky:
        y = jnp.where(y > 0, y, NEG_SLOPE * y)
    o_ref[...] = y.astype(o_ref.dtype)


def _hgconv_pair_kernel(xa_ref, xb_ref, adj_ab_ref, adj_ba_ref, w_ref, b_ref,
                        oa_ref, ob_ref, *, n_layers):
    """All gconv layers for one modality pair in one kernel; x stays in VMEM.

    adj_ab: (N, N) degree-normalized cross adjacency (a aggregates from b),
    adj_ba: (N, N) its transpose-normalized counterpart.
    w_ref: (L, HP, HP)   b_ref: (L, 1, HP)
    """
    xa = xa_ref[...]
    xb = xb_ref[...]
    adj_ab = adj_ab_ref[...]
    adj_ba = adj_ba_ref[...]
    for l in range(n_layers):
        w = w_ref[l]
        b = b_ref[l]
        agg_a = jnp.dot(adj_ab, xb, preferred_element_type=jnp.float32)
        agg_b = jnp.dot(adj_ba, xa, preferred_element_type=jnp.float32)
        ya = jnp.dot(agg_a, w, preferred_element_type=jnp.float32) + b
        yb = jnp.dot(agg_b, w, preferred_element_type=jnp.float32) + b
        xa = xa + jnp.where(ya > 0, ya, NEG_SLOPE * ya)    # residual
        xb = xb + jnp.where(yb > 0, yb, NEG_SLOPE * yb)
    oa_ref[...] = xa
    ob_ref[...] = xb


def _fusion_kernel(x_ref, w_ref, b_ref, o_ref, *, n_feats):
    """Shared modal-fusion Linear+LeakyReLU applied to n_feats stacked inputs,
    summed and averaged -- one kernel, weight DMA'd once."""
    acc = jnp.zeros(o_ref.shape, jnp.float32)
    for f in range(n_feats):
        y = jnp.dot(x_ref[f], w_ref[...], preferred_element_type=jnp.float32)
        y = y + b_ref[...]
        acc = acc + jnp.where(y > 0, y, NEG_SLOPE * y)
    o_ref[...] = acc * (1.0 / n_feats)


def _shift_kernel(xi_ref, xj_ref, wt_ref, wb_ref, b1_ref, w2_ref, b2_ref, o_ref):
    """Pair shift head: LeakyReLU(x_i @ W_top + x_j @ W_bot + b1) @ W2 + b2.
    Avoids materializing the 2H-wide concatenated pair features."""
    h = (jnp.dot(xi_ref[...], wt_ref[...], preferred_element_type=jnp.float32)
         + jnp.dot(xj_ref[...], wb_ref[...], preferred_element_type=jnp.float32)
         + b1_ref[...])
    h = jnp.where(h > 0, h, NEG_SLOPE * h)
    o_ref[...] = jnp.dot(h, w2_ref[...], preferred_element_type=jnp.float32) + b2_ref[...]


# ------------------------------ kernel wrappers ------------------------------

def bn_concat_linear(x_stack, gamma, beta, w_stack, bias):
    F, M, D = x_stack.shape
    HP = w_stack.shape[-1]
    return pl.pallas_call(
        functools.partial(_bn_concat_linear_kernel, n_slabs=F),
        out_shape=jax.ShapeDtypeStruct((M, HP), jnp.float32),
    )(x_stack, gamma, beta, w_stack, bias)


def linear_block(x, w, b, *, leaky=False):
    M = x.shape[0]
    N = w.shape[1]
    return pl.pallas_call(
        functools.partial(_linear_kernel, leaky=leaky),
        out_shape=jax.ShapeDtypeStruct((M, N), jnp.float32),
    )(x, w, b)


def heter_gconv_edge(feat_a, feat_b, adj_ab, adj_ba, w_stack, b_stack):
    n, hp = feat_a.shape
    n_layers = int(w_stack.shape[0])
    return pl.pallas_call(
        functools.partial(_hgconv_pair_kernel, n_layers=n_layers),
        out_shape=(jax.ShapeDtypeStruct((n, hp), jnp.float32),
                   jax.ShapeDtypeStruct((n, hp), jnp.float32)),
    )(feat_a, feat_b, adj_ab, adj_ba, w_stack, b_stack)


def modal_fusion(x_stack, w, b):
    F, n, hp = x_stack.shape
    return pl.pallas_call(
        functools.partial(_fusion_kernel, n_feats=F),
        out_shape=jax.ShapeDtypeStruct((n, hp), jnp.float32),
    )(x_stack, w, b)


def shift_head(xi, xj, w_top, w_bot, b1, w2, b2):
    P, hp = xi.shape
    out_w = w2.shape[1]
    return pl.pallas_call(
        _shift_kernel,
        out_shape=jax.ShapeDtypeStruct((P, out_w), jnp.float32),
    )(xi, xj, w_top, w_bot, b1, w2, b2)


# ------------------------------- glue helpers -------------------------------

def batch_to_all(x, dia_lengths):
    """(seq, batch, H) padded -> (sum(dia_lengths), H) packed node features."""
    parts = [x[:L, j, :] for j, L in enumerate(dia_lengths)]
    return jnp.concatenate(parts, axis=0)


def build_cross_adj_norm(dia_lengths, win_p, win_f):
    """Degree-normalized bipartite cross-modal adjacency (two (N,N) blocks)."""
    dia_id = np.concatenate([np.full(L, j) for j, L in enumerate(dia_lengths)])
    pos = np.concatenate([np.arange(L) for L in dia_lengths])
    same = dia_id[:, None] == dia_id[None, :]
    diff = pos[None, :] - pos[:, None]
    win = (diff >= -win_p) & (diff <= win_f)
    m = (same & win).astype(np.float32)                     # (N, N)
    deg_a = np.maximum(m.sum(axis=1, keepdims=True), 1.0)
    deg_b = np.maximum(m.T.sum(axis=1, keepdims=True), 1.0)
    return jnp.asarray(m / deg_a), jnp.asarray(m.T / deg_b)


def build_shift_pairs(dia_lengths, shift_win):
    idx_i, idx_j = [], []
    off = 0
    for L in dia_lengths:
        for i in range(L):
            for j in range(i + 1, min(i + shift_win, L - 1) + 1):
                idx_i.append(off + i)
                idx_j.append(off + j)
        off += L
    return np.asarray(idx_i, np.int32), np.asarray(idx_j, np.int32)


# ------------------------------- parameters ---------------------------------

def init_linear(key, in_dim, out_dim):
    k1, k2 = jax.random.split(key)
    bound = 1.0 / np.sqrt(in_dim)
    w = jax.random.uniform(k1, (in_dim, out_dim), jnp.float32, -bound, bound)
    b = jax.random.uniform(k2, (out_dim,), jnp.float32, -bound, bound)
    return w, b


def _pad_w(w, rows, cols):
    return jnp.pad(w, ((0, rows - w.shape[0]), (0, cols - w.shape[1])))


def _pad_b(b, cols):
    b = b.reshape(1, -1)
    return jnp.pad(b, ((0, 0), (0, cols - b.shape[1])))


def init_params(key, embedding_dims, hidden_dim, n_classes_emo, heter_n_layers,
                textf_mode, hp=LANE):
    assert textf_mode == "concat4", "only concat4 branch implemented"
    keys = iter(jax.random.split(key, 64))
    dim_t, dim_v, dim_a = embedding_dims
    H = hidden_dim
    p = {"hp": hp, "hidden": H, "n_emo": n_classes_emo}

    # 13 BatchNorm1d modules exist; only the 4 feeding concat4 affect the output.
    p["bn_gamma"] = jnp.ones((4, 1, dim_t), jnp.float32)
    p["bn_beta"] = jnp.zeros((4, 1, dim_t), jnp.float32)

    # dim layers (weights pre-transposed to (in, out), lane-padded to HP).
    w, b = init_linear(next(keys), 4 * dim_t, H)
    p["dim_t_w"] = jnp.pad(w.reshape(4, dim_t, H), ((0, 0), (0, 0), (0, hp - H)))
    p["dim_t_b"] = _pad_b(b, hp)
    w, b = init_linear(next(keys), dim_v, H)
    p["dim_v_w"], p["dim_v_b"] = _pad_w(w, dim_v, hp), _pad_b(b, hp)
    w, b = init_linear(next(keys), dim_a, H)
    p["dim_a_w"], p["dim_a_b"] = _pad_w(w, dim_a, hp), _pad_b(b, hp)

    # heterogeneous graph conv stacks (layer weights stacked along L).
    for name, n_layers in zip(("tv", "ta", "va"), heter_n_layers):
        ws, bs = [], []
        for _ in range(n_layers):
            w, b = init_linear(next(keys), H, H)
            ws.append(_pad_w(w, hp, hp))
            bs.append(_pad_b(b, hp))
        p["hgc_%s_w" % name] = jnp.stack(ws, axis=0)          # (L, HP, HP)
        p["hgc_%s_b" % name] = jnp.stack(bs, axis=0)          # (L, 1, HP)

    # modal fusion (shared Linear+LeakyReLU).
    w, b = init_linear(next(keys), H, H)
    p["fusion_w"], p["fusion_b"] = _pad_w(w, hp, hp), _pad_b(b, hp)

    # emo + sen heads packed into one lane-dense slab.
    we, be = init_linear(next(keys), H, n_classes_emo)
    ws, bs = init_linear(next(keys), H, 3)
    p["heads_w"] = _pad_w(jnp.concatenate([we, ws], axis=1), hp, LANE)
    p["heads_b"] = _pad_b(jnp.concatenate([be, bs], axis=0), LANE)

    # shift head: split W1 into top/bottom halves so pair-concat is never built.
    w1, b1 = init_linear(next(keys), 2 * H, H)
    p["shift_w_top"] = _pad_w(w1[:H], hp, hp)
    p["shift_w_bot"] = _pad_w(w1[H:], hp, hp)
    p["shift_b1"] = _pad_b(b1, hp)
    w2, b2 = init_linear(next(keys), H, 2)
    p["shift_w2"], p["shift_b2"] = _pad_w(w2, hp, LANE), _pad_b(b2, LANE)
    return p


# --------------------------------- forward ----------------------------------

def graphsmile_forward(params, text_feats, feature_v, feature_a, dia_lengths, cfg):
    seq_len, batch, dim_t = text_feats[0].shape
    H = cfg["hidden_dim"]
    HP = params["hp"]
    n_emo = params["n_emo"]
    M = seq_len * batch

    # fused BN(x4) + concat4 + dim_t Linear + LeakyReLU (dropout == identity).
    t_stack = jnp.stack([text_feats[i].reshape(M, dim_t) for i in range(4)], axis=0)
    featdim_t = bn_concat_linear(t_stack, params["bn_gamma"], params["bn_beta"],
                                 params["dim_t_w"], params["dim_t_b"])
    featdim_v = linear_block(feature_v.reshape(M, -1),
                             params["dim_v_w"], params["dim_v_b"], leaky=True)
    featdim_a = linear_block(feature_a.reshape(M, -1),
                             params["dim_a_w"], params["dim_a_b"], leaky=True)
    featdim_t = featdim_t.reshape(seq_len, batch, HP)
    featdim_v = featdim_v.reshape(seq_len, batch, HP)
    featdim_a = featdim_a.reshape(seq_len, batch, HP)

    # batch_to_all_tva: pack valid utterances per dialogue.
    emo_t = batch_to_all(featdim_t, dia_lengths)
    emo_v = batch_to_all(featdim_v, dia_lengths)
    emo_a = batch_to_all(featdim_a, dia_lengths)

    # heterogeneous cross-modal graph convolutions (shared, pre-normalized edges).
    adj_ab, adj_ba = build_cross_adj_norm(dia_lengths, cfg["win_p"], cfg["win_f"])
    tv_t, tv_v = heter_gconv_edge(emo_t, emo_v, adj_ab, adj_ba,
                                  params["hgc_tv_w"], params["hgc_tv_b"])
    ta_t, ta_a = heter_gconv_edge(emo_t, emo_a, adj_ab, adj_ba,
                                  params["hgc_ta_w"], params["hgc_ta_b"])
    va_v, va_a = heter_gconv_edge(emo_v, emo_a, adj_ab, adj_ba,
                                  params["hgc_va_w"], params["hgc_va_b"])

    # modal fusion: 6 shared Linear+LeakyReLU applications in one kernel.
    fused_in = jnp.stack([tv_t, ta_t, tv_v, va_v, ta_a, va_a], axis=0)  # (6, N, HP)
    feat_fusion_p = modal_fusion(fused_in, params["fusion_w"], params["fusion_b"])

    # emo + sen heads: one lane-dense matmul, slice in the wrapper.
    heads = linear_block(feat_fusion_p, params["heads_w"], params["heads_b"])
    logit_emo = heads[:, :n_emo]
    logit_sen = heads[:, n_emo:n_emo + 3]

    # sentiment-shift head over windowed utterance pairs.
    idx_i, idx_j = build_shift_pairs(dia_lengths, cfg["shift_win"])
    if len(idx_i) == 0:
        logit_shift = jnp.zeros((0, 2), jnp.float32)
    else:
        xi = jnp.take(feat_fusion_p, jnp.asarray(idx_i), axis=0)
        xj = jnp.take(feat_fusion_p, jnp.asarray(idx_j), axis=0)
        shift_out = shift_head(xi, xj, params["shift_w_top"], params["shift_w_bot"],
                               params["shift_b1"], params["shift_w2"],
                               params["shift_b2"])
        logit_shift = shift_out[:, :2]

    return logit_emo, logit_sen, logit_shift, feat_fusion_p[:, :H]


# ----------------------------------- main ------------------------------------

if __name__ == "__main__":
    cfg = dict(textf_mode="concat4", hidden_dim=32, drop=0.1, win_p=2, win_f=2,
               shift_win=3, heter_n_layers=[2, 2, 2])
    embedding_dims = [20, 24, 28]
    n_classes_emo = 7
    seq_len, batch = 8, 2
    dia_lengths = [8, 6]
    n_nodes = sum(dia_lengths)

    key = jax.random.PRNGKey(0)
    pkey, dkey = jax.random.split(key)
    params = init_params(pkey, embedding_dims, cfg["hidden_dim"], n_classes_emo,
                         cfg["heter_n_layers"], cfg["textf_mode"])

    dkeys = jax.random.split(dkey, 15)
    text_feats = [jax.random.normal(dkeys[i], (seq_len, batch, embedding_dims[0]),
                                    jnp.float32) for i in range(13)]
    feature_v = jax.random.normal(dkeys[13], (seq_len, batch, embedding_dims[1]),
                                  jnp.float32)
    feature_a = jax.random.normal(dkeys[14], (seq_len, batch, embedding_dims[2]),
                                  jnp.float32)
    # umask / qmask appear in the PyTorch signature but are unused by the forward pass.

    outs = graphsmile_forward(params, text_feats, feature_v, feature_a,
                              dia_lengths, cfg)
    outs = jax.block_until_ready(outs)
    logit_emo, logit_sen, logit_shift, feat_fusion = outs

    assert logit_emo.shape == (n_nodes, n_classes_emo)
    assert logit_sen.shape == (n_nodes, 3)
    assert logit_shift.shape[1] == 2
    assert feat_fusion.shape == (n_nodes, cfg["hidden_dim"])
    assert all(bool(jnp.all(jnp.isfinite(o))) for o in
               (logit_emo, logit_sen, logit_shift, feat_fusion))
    print("KERNEL_OK")
</pallas_src>

<mosaic_0001>
module attributes {stable_mosaic.version = 11 : i64} {
  func.func @_bn_concat_linear_kernel(%arg0: memref<4x16x20xf32, #tpu.memory_space<vmem>>, %arg1: memref<4x1x20xf32, #tpu.memory_space<vmem>>, %arg2: memref<4x1x20xf32, #tpu.memory_space<vmem>>, %arg3: memref<4x20x128xf32, #tpu.memory_space<vmem>>, %arg4: memref<1x128xf32, #tpu.memory_space<vmem>>, %arg5: memref<16x128xf32, #tpu.memory_space<vmem>>) attributes {dimension_semantics = [], scalar_prefetch = 0 : i64, scratch_operands = 0 : i64, tpu.core_type = #tpu.core_type<tc>} {
    %cst = arith.constant 0.000000e+00 : f32
    %0 = vector.broadcast %cst : f32 to vector<16x128xf32>
    %c0 = arith.constant 0 : index
    %c0_0 = arith.constant 0 : index
    %1 = vector.load %arg4[%c0, %c0_0] : memref<1x128xf32, #tpu.memory_space<vmem>>, vector<1x128xf32>
    %2 = vector.broadcast %1 : vector<1x128xf32> to vector<16x128xf32>
    %3 = arith.addf %0, %2 : vector<16x128xf32>
    %c0_1 = arith.constant 0 : index
    %c0_2 = arith.constant 0 : index
    %c0_3 = arith.constant 0 : index
    %4 = vector.load %arg0[%c0_1, %c0_2, %c0_3] : memref<4x16x20xf32, #tpu.memory_space<vmem>>, vector<1x16x20xf32>
    %5 = vector.shape_cast %4 : vector<1x16x20xf32> to vector<16x20xf32>
    %cst_4 = arith.constant dense<0.000000e+00> : vector<20xf32>
    %6 = vector.multi_reduction <add>, %5, %cst_4 [0] : vector<16x20xf32> to vector<20xf32>
    %7 = vector.shape_cast %6 : vector<20xf32> to vector<1x20xf32>
    %cst_5 = arith.constant 1.600000e+01 : f32
    %8 = vector.broadcast %cst_5 : f32 to vector<1x20xf32>
    %9 = arith.divf %7, %8 : vector<1x20xf32>
    %10 = vector.broadcast %9 : vector<1x20xf32> to vector<16x20xf32>
    %11 = arith.subf %5, %10 : vector<16x20xf32>
    %12 = arith.mulf %11, %11 : vector<16x20xf32>
    %cst_6 = arith.constant dense<0.000000e+00> : vector<20xf32>
    %13 = vector.multi_reduction <add>, %12, %cst_6 [0] : vector<16x20xf32> to vector<20xf32>
    %14 = vector.shape_cast %13 : vector<20xf32> to vector<1x20xf32>
    %cst_7 = arith.constant 1.600000e+01 : f32
    %15 = vector.broadcast %cst_7 : f32 to vector<1x20xf32>
    %16 = arith.divf %14, %15 : vector<1x20xf32>
    %17 = vector.broadcast %9 : vector<1x20xf32> to vector<16x20xf32>
    %18 = arith.subf %5, %17 : vector<16x20xf32>
    %cst_8 = arith.constant 9.99999974E-6 : f32
    %19 = vector.broadcast %cst_8 : f32 to vector<1x20xf32>
    %20 = arith.addf %16, %19 : vector<1x20xf32>
    %21 = math.rsqrt %20 : vector<1x20xf32>
    %22 = vector.broadcast %21 : vector<1x20xf32> to vector<16x20xf32>
    %23 = arith.mulf %18, %22 : vector<16x20xf32>
    %c0_9 = arith.constant 0 : index
    %c0_10 = arith.constant 0 : index
    %c0_11 = arith.constant 0 : index
    %24 = vector.load %arg1[%c0_9, %c0_10, %c0_11] : memref<4x1x20xf32, #tpu.memory_space<vmem>>, vector<1x1x20xf32>
    %25 = vector.shape_cast %24 : vector<1x1x20xf32> to vector<1x20xf32>
    %26 = vector.broadcast %25 : vector<1x20xf32> to vector<16x20xf32>
    %27 = arith.mulf %23, %26 : vector<16x20xf32>
    %c0_12 = arith.constant 0 : index
    %c0_13 = arith.constant 0 : index
    %c0_14 = arith.constant 0 : index
    %28 = vector.load %arg2[%c0_12, %c0_13, %c0_14] : memref<4x1x20xf32, #tpu.memory_space<vmem>>, vector<1x1x20xf32>
    %29 = vector.shape_cast %28 : vector<1x1x20xf32> to vector<1x20xf32>
    %30 = vector.broadcast %29 : vector<1x20xf32> to vector<16x20xf32>
    %31 = arith.addf %27, %30 : vector<16x20xf32>
    %c0_15 = arith.constant 0 : index
    %c0_16 = arith.constant 0 : index
    %c0_17 = arith.constant 0 : index
    %32 = vector.load %arg3[%c0_15, %c0_16, %c0_17] : memref<4x20x128xf32, #tpu.memory_space<vmem>>, vector<1x20x128xf32>
    %33 = vector.shape_cast %32 : vector<1x20x128xf32> to vector<20x128xf32>
    %cst_18 = arith.constant dense<0.000000e+00> : vector<16x128xf32>
    %34 = tpu.matmul %31, %33, %cst_18 {dimension_numbers = #tpu.dot_dimension_numbers<[1], [0], [0], [1], [0, 0, 1, 1], [], []>} : vector<16x20xf32>, vector<20x128xf32>, vector<16x128xf32> -> vector<16x128xf32>
    %35 = arith.addf %3, %34 : vector<16x128xf32>
    %c1 = arith.constant 1 : index
    %c0_19 = arith.constant 0 : index
    %c0_20 = arith.constant 0 : index
    %36 = vector.load %arg0[%c1, %c0_19, %c0_20] : memref<4x16x20xf32, #tpu.memory_space<vmem>>, vector<1x16x20xf32>
    %37 = vector.shape_cast %36 : vector<1x16x20xf32> to vector<16x20xf32>
    %cst_21 = arith.constant dense<0.000000e+00> : vector<20xf32>
    %38 = vector.multi_reduction <add>, %37, %cst_21 [0] : vector<16x20xf32> to vector<20xf32>
    %39 = vector.shape_cast %38 : vector<20xf32> to vector<1x20xf32>
    %cst_22 = arith.constant 1.600000e+01 : f32
    %40 = vector.broadcast %cst_22 : f32 to vector<1x20xf32>
    %41 = arith.divf %39, %40 : vector<1x20xf32>
    %42 = vector.broadcast %41 : vector<1x20xf32> to vector<16x20xf32>
    %43 = arith.subf %37, %42 : vector<16x20xf32>
    %44 = arith.mulf %43, %43 : vector<16x20xf32>
    %cst_23 = arith.constant dense<0.000000e+00> : vector<20xf32>
    %45 = vector.multi_reduction <add>, %44, %cst_23 [0] : vector<16x20xf32> to vector<20xf32>
    %46 = vector.shape_cast %45 : vector<20xf32> to vector<1x20xf32>
    %cst_24 = arith.constant 1.600000e+01 : f32
    %47 = vector.broadcast %cst_24 : f32 to vector<1x20xf32>
    %48 = arith.divf %46, %47 : vector<1x20xf32>
    %49 = vector.broadcast %41 : vector<1x20xf32> to vector<16x20xf32>
    %50 = arith.subf %37, %49 : vector<16x20xf32>
    %cst_25 = arith.constant 9.99999974E-6 : f32
    %51 = vector.broadcast %cst_25 : f32 to vector<1x20xf32>
    %52 = arith.addf %48, %51 : vector<1x20xf32>
    %53 = math.rsqrt %52 : vector<1x20xf32>
    %54 = vector.broadcast %53 : vector<1x20xf32> to vector<16x20xf32>
    %55 = arith.mulf %50, %54 : vector<16x20xf32>
    %c1_26 = arith.constant 1 : index
    %c0_27 = arith.constant 0 : index
    %c0_28 = arith.constant 0 : index
    %56 = vector.load %arg1[%c1_26, %c0_27, %c0_28] : memref<4x1x20xf32, #tpu.memory_space<vmem>>, vector<1x1x20xf32>
    %57 = vector.shape_cast %56 : vector<1x1x20xf32> to vector<1x20xf32>
    %58 = vector.broadcast %57 : vector<1x20xf32> to vector<16x20xf32>
    %59 = arith.mulf %55, %58 : vector<16x20xf32>
    %c1_29 = arith.constant 1 : index
    %c0_30 = arith.constant 0 : index
    %c0_31 = arith.constant 0 : index
    %60 = vector.load %arg2[%c1_29, %c0_30, %c0_31] : memref<4x1x20xf32, #tpu.memory_space<vmem>>, vector<1x1x20xf32>
    %61 = vector.shape_cast %60 : vector<1x1x20xf32> to vector<1x20xf32>
    %62 = vector.broadcast %61 : vector<1x20xf32> to vector<16x20xf32>
    %63 = arith.addf %59, %62 : vector<16x20xf32>
    %c1_32 = arith.constant 1 : index
    %c0_33 = arith.constant 0 : index
    %c0_34 = arith.constant 0 : index
    %64 = vector.load %arg3[%c1_32, %c0_33, %c0_34] : memref<4x20x128xf32, #tpu.memory_space<vmem>>, vector<1x20x128xf32>
    %65 = vector.shape_cast %64 : vector<1x20x128xf32> to vector<20x128xf32>
    %cst_35 = arith.constant dense<0.000000e+00> : vector<16x128xf32>
    %66 = tpu.matmul %63, %65, %cst_35 {dimension_numbers = #tpu.dot_dimension_numbers<[1], [0], [0], [1], [0, 0, 1, 1], [], []>} : vector<16x20xf32>, vector<20x128xf32>, vector<16x128xf32> -> vector<16x128xf32>
    %67 = arith.addf %35, %66 : vector<16x128xf32>
    %c2 = arith.constant 2 : index
    %c0_36 = arith.constant 0 : index
    %c0_37 = arith.constant 0 : index
    %68 = vector.load %arg0[%c2, %c0_36, %c0_37] : memref<4x16x20xf32, #tpu.memory_space<vmem>>, vector<1x16x20xf32>
    %69 = vector.shape_cast %68 : vector<1x16x20xf32> to vector<16x20xf32>
    %cst_38 = arith.constant dense<0.000000e+00> : vector<20xf32>
    %70 = vector.multi_reduction <add>, %69, %cst_38 [0] : vector<16x20xf32> to vector<20xf32>
    %71 = vector.shape_cast %70 : vector<20xf32> to vector<1x20xf32>
    %cst_39 = arith.constant 1.600000e+01 : f32
    %72 = vector.broadcast %cst_39 : f32 to vector<1x20xf32>
    %73 = arith.divf %71, %72 : vector<1x20xf32>
    %74 = vector.broadcast %73 : vector<1x20xf32> to vector<16x20xf32>
    %75 = arith.subf %69, %74 : vector<16x20xf32>
    %76 = arith.mulf %75, %75 : vector<16x20xf32>
    %cst_40 = arith.constant dense<0.000000e+00> : vector<20xf32>
    %77 = vector.multi_reduction <add>, %76, %cst_40 [0] : vector<16x20xf32> to vector<20xf32>
    %78 = vector.shape_cast %77 : vector<20xf32> to vector<1x20xf32>
    %cst_41 = arith.constant 1.600000e+01 : f32
    %79 = vector.broadcast %cst_41 : f32 to vector<1x20xf32>
    %80 = arith.divf %78, %79 : vector<1x20xf32>
    %81 = vector.broadcast %73 : vector<1x20xf32> to vector<16x20xf32>
    %82 = arith.subf %69, %81 : vector<16x20xf32>
    %cst_42 = arith.constant 9.99999974E-6 : f32
    %83 = vector.broadcast %cst_42 : f32 to vector<1x20xf32>
    %84 = arith.addf %80, %83 : vector<1x20xf32>
    %85 = math.rsqrt %84 : vector<1x20xf32>
    %86 = vector.broadcast %85 : vector<1x20xf32> to vector<16x20xf32>
    %87 = arith.mulf %82, %86 : vector<16x20xf32>
    %c2_43 = arith.constant 2 : index
    %c0_44 = arith.constant 0 : index
    %c0_45 = arith.constant 0 : index
    %88 = vector.load %arg1[%c2_43, %c0_44, %c0_45] : memref<4x1x20xf32, #tpu.memory_space<vmem>>, vector<1x1x20xf32>
    %89 = vector.shape_cast %88 : vector<1x1x20xf32> to vector<1x20xf32>
    %90 = vector.broadcast %89 : vector<1x20xf32> to vector<16x20xf32>
    %91 = arith.mulf %87, %90 : vector<16x20xf32>
    %c2_46 = arith.constant 2 : index
    %c0_47 = arith.constant 0 : index
    %c0_48 = arith.constant 0 : index
    %92 = vector.load %arg2[%c2_46, %c0_47, %c0_48] : memref<4x1x20xf32, #tpu.memory_space<vmem>>, vector<1x1x20xf32>
    %93 = vector.shape_cast %92 : vector<1x1x20xf32> to vector<1x20xf32>
    %94 = vector.broadcast %93 : vector<1x20xf32> to vector<16x20xf32>
    %95 = arith.addf %91, %94 : vector<16x20xf32>
    %c2_49 = arith.constant 2 : index
    %c0_50 = arith.constant 0 : index
    %c0_51 = arith.constant 0 : index
    %96 = vector.load %arg3[%c2_49, %c0_50, %c0_51] : memref<4x20x128xf32, #tpu.memory_space<vmem>>, vector<1x20x128xf32>
    %97 = vector.shape_cast %96 : vector<1x20x128xf32> to vector<20x128xf32>
    %cst_52 = arith.constant dense<0.000000e+00> : vector<16x128xf32>
    %98 = tpu.matmul %95, %97, %cst_52 {dimension_numbers = #tpu.dot_dimension_numbers<[1], [0], [0], [1], [0, 0, 1, 1], [], []>} : vector<16x20xf32>, vector<20x128xf32>, vector<16x128xf32> -> vector<16x128xf32>
    %99 = arith.addf %67, %98 : vector<16x128xf32>
    %c3 = arith.constant 3 : index
    %c0_53 = arith.constant 0 : index
    %c0_54 = arith.constant 0 : index
    %100 = vector.load %arg0[%c3, %c0_53, %c0_54] : memref<4x16x20xf32, #tpu.memory_space<vmem>>, vector<1x16x20xf32>
    %101 = vector.shape_cast %100 : vector<1x16x20xf32> to vector<16x20xf32>
    %cst_55 = arith.constant dense<0.000000e+00> : vector<20xf32>
    %102 = vector.multi_reduction <add>, %101, %cst_55 [0] : vector<16x20xf32> to vector<20xf32>
    %103 = vector.shape_cast %102 : vector<20xf32> to vector<1x20xf32>
    %cst_56 = arith.constant 1.600000e+01 : f32
    %104 = vector.broadcast %cst_56 : f32 to vector<1x20xf32>
    %105 = arith.divf %103, %104 : vector<1x20xf32>
    %106 = vector.broadcast %105 : vector<1x20xf32> to vector<16x20xf32>
    %107 = arith.subf %101, %106 : vector<16x20xf32>
    %108 = arith.mulf %107, %107 : vector<16x20xf32>
    %cst_57 = arith.constant dense<0.000000e+00> : vector<20xf32>
    %109 = vector.multi_reduction <add>, %108, %cst_57 [0] : vector<16x20xf32> to vector<20xf32>
    %110 = vector.shape_cast %109 : vector<20xf32> to vector<1x20xf32>
    %cst_58 = arith.constant 1.600000e+01 : f32
    %111 = vector.broadcast %cst_58 : f32 to vector<1x20xf32>
    %112 = arith.divf %110, %111 : vector<1x20xf32>
    %113 = vector.broadcast %105 : vector<1x20xf32> to vector<16x20xf32>
    %114 = arith.subf %101, %113 : vector<16x20xf32>
    %cst_59 = arith.constant 9.99999974E-6 : f32
    %115 = vector.broadcast %cst_59 : f32 to vector<1x20xf32>
    %116 = arith.addf %112, %115 : vector<1x20xf32>
    %117 = math.rsqrt %116 : vector<1x20xf32>
    %118 = vector.broadcast %117 : vector<1x20xf32> to vector<16x20xf32>
    %119 = arith.mulf %114, %118 : vector<16x20xf32>
    %c3_60 = arith.constant 3 : index
    %c0_61 = arith.constant 0 : index
    %c0_62 = arith.constant 0 : index
    %120 = vector.load %arg1[%c3_60, %c0_61, %c0_62] : memref<4x1x20xf32, #tpu.memory_space<vmem>>, vector<1x1x20xf32>
    %121 = vector.shape_cast %120 : vector<1x1x20xf32> to vector<1x20xf32>
    %122 = vector.broadcast %121 : vector<1x20xf32> to vector<16x20xf32>
    %123 = arith.mulf %119, %122 : vector<16x20xf32>
    %c3_63 = arith.constant 3 : index
    %c0_64 = arith.constant 0 : index
    %c0_65 = arith.constant 0 : index
    %124 = vector.load %arg2[%c3_63, %c0_64, %c0_65] : memref<4x1x20xf32, #tpu.memory_space<vmem>>, vector<1x1x20xf32>
    %125 = vector.shape_cast %124 : vector<1x1x20xf32> to vector<1x20xf32>
    %126 = vector.broadcast %125 : vector<1x20xf32> to vector<16x20xf32>
    %127 = arith.addf %123, %126 : vector<16x20xf32>
    %c3_66 = arith.constant 3 : index
    %c0_67 = arith.constant 0 : index
    %c0_68 = arith.constant 0 : index
    %128 = vector.load %arg3[%c3_66, %c0_67, %c0_68] : memref<4x20x128xf32, #tpu.memory_space<vmem>>, vector<1x20x128xf32>
    %129 = vector.shape_cast %128 : vector<1x20x128xf32> to vector<20x128xf32>
    %cst_69 = arith.constant dense<0.000000e+00> : vector<16x128xf32>
    %130 = tpu.matmul %127, %129, %cst_69 {dimension_numbers = #tpu.dot_dimension_numbers<[1], [0], [0], [1], [0, 0, 1, 1], [], []>} : vector<16x20xf32>, vector<20x128xf32>, vector<16x128xf32> -> vector<16x128xf32>
    %131 = arith.addf %99, %130 : vector<16x128xf32>
    %cst_70 = arith.constant 0.000000e+00 : f32
    %132 = vector.broadcast %cst_70 : f32 to vector<16x128xf32>
    %133 = arith.cmpf ogt, %131, %132 : vector<16x128xf32>
    %cst_71 = arith.constant 0.00999999977 : f32
    %134 = vector.broadcast %cst_71 : f32 to vector<16x128xf32>
    %135 = arith.mulf %134, %131 : vector<16x128xf32>
    %136 = arith.select %133, %131, %135 : vector<16x128xi1>, vector<16x128xf32>
    %c0_72 = arith.constant 0 : index
    %c0_73 = arith.constant 0 : index
    %137 = vector.load %arg5[%c0_72, %c0_73] : memref<16x128xf32, #tpu.memory_space<vmem>>, vector<16x128xf32>
    tpu.vector_store %arg5[%c0_72, %c0_73], %136 {strides = array<i32>} : memref<16x128xf32, #tpu.memory_space<vmem>>, vector<16x128xf32>,
    return
  }
}

</mosaic_0001>

<bundles_post_ra>
// kernel: tpu_custom_call.1
= control target key start
LH: loop header
LB: loop body
LE: loop exit
PB: predicated region body
PF: predicated region fallthrough
CT: control target
= control target key end

     0   :  { %vm31_vm0 = vcmask 162816   ;;  %vm88_vm1 = vcmask 1043456   ;;  %s985_s0 = inlined_call_operand.vmem [shape: f32[4,16,20], index: 0, kind: input, shape index: {}]   ;;  %s986_s1 = inlined_call_operand.vmem [shape: f32[4,1,20], index: 1, kind: input, shape index: {}]   ;;  %s987_s2 = inlined_call_operand.vmem [shape: f32[4,1,20], index: 2, kind: input, shape index: {}]   ;;  %s988_s3 = inlined_call_operand.vmem [shape: f32[4,20,128], index: 3, kind: input, shape index: {}]   ;;  %s989_s4 = inlined_call_operand.vmem [shape: f32[1,128], index: 4, kind: input, shape index: {}]   ;;  %s990_s5 = inlined_call_operand.hbm [shape: f32[16,128], index: 5, kind: output, shape index: {}]  }
   0x1   :  { %v79_v0 = vld [vmem:[%s988_s3] sm:$0xff]  ;;  %v80_v1 = vld [vmem:[%s988_s3 + $0x8] sm:$0xff]  ;;  %v640_v2 = vld [vmem:[%s988_s3 + $0x30] sm:$0xff] }
   0x2   :  { %v714_v3 = vpack.c.bf16 %v80_v1, %v79_v0  ;;  %v641_v4 = vld [vmem:[%s988_s3 + $0x38] sm:$0xff]  ;;  %v81_v6 = vld [vmem:[%s988_s3 + $0x10] sm:$0xf]  ;;  %v29_v7 = vld [vmem:[%s985_s0] sm:$0xff] }
   0x3   :  { %v722_v5 = vpack.c.bf16 %v641_v4, %v640_v2  ;;  %v30_v8 = vld [vmem:[%s985_s0 + $0x8] sm:$0xff]  ;;  %v642_v9 = vld [vmem:[%s988_s3 + $0x40] sm:$0xf]  ;;  %v32_v10 = vsel %vm31_vm0, %v29_v7, 0.0  ;;  %v628_v12 = vld [vmem:[%s988_s3 + $0x18] sm:$0xff] }
   0x4   :  { %715 = vmatprep.subr.bf16.mxu1 %v714_v3  ;;  %v33_v11 = vsel %vm31_vm0, %v30_v8, 0.0  ;;  %v629_v13 = vld [vmem:[%s988_s3 + $0x20] sm:$0xff]  ;;  %v635_v16 = vld [vmem:[%s985_s0 + $0x28] sm:$0xff]  ;;  %v653_v21 = vld [vmem:[%s988_s3 + $0x50] sm:$0xff] }
   0x5   :  { %717 = vmatpush3.bf16.msra.mxu1 %v714_v3  ;;  %723 = vmatprep.subr.bf16.mxu0 %v722_v5  ;;  %v34_v14 = vadd.f32 %v33_v11, %v32_v10  ;;  %v634_v15 = vld [vmem:[%s985_s0 + $0x20] sm:$0xff]  ;;  %v845_v17 = vpack.c.bf16 %v629_v13, %v628_v12  ;;  %v314_v19 = vsel %vm31_vm0, %v635_v16, 0.0  ;;  %v652_v20 = vld [vmem:[%s988_s3 + $0x48] sm:$0xff]  ;;  %v622_v25 = vld [vmem:[%s985_s0 + $0x10] sm:$0xff] }
   0x6   :  { %725 = vmatpush3.bf16.msra.mxu0 %v722_v5  ;;  %682 = vmatprep.subr.msk.mxu1 %vm88_vm1, %v81_v6  ;;  %v313_v18 = vsel %vm31_vm0, %v634_v15, 0.0  ;;  %v856_v24 = vpack.c.bf16 %v653_v21, %v652_v20  ;;  %v623_v26 = vld [vmem:[%s985_s0 + $0x18] sm:$0xff]  ;;  %v172_v27 = vsel %vm31_vm0, %v622_v25, 0.0  ;;  %v646_v31 = vld [vmem:[%s985_s0 + $0x30] sm:$0xff] }
   0x7   :  { %700 = vmatprep.subr.msk.mxu0 %vm88_vm1, %v642_v9  ;;  %v35_v22 = vrot.slane %v34_v14, 4  ;;  %v315_v23 = vadd.f32 %v314_v19, %v313_v18  ;;  %v173_v30 = vsel %vm31_vm0, %v623_v26, 0.0  ;;  %v647_v32 = vld [vmem:[%s985_s0 + $0x38] sm:$0xff]  ;;  %v454_v34 = vsel %vm31_vm0, %v646_v31, 0.0 }
   0x8   :  { %v174_v33 = vadd.f32 %v173_v30, %v172_v27  ;;  %v455_v35 = vsel %vm31_vm0, %v647_v32, 0.0 }
   0x9   :  { %683 = vmatpush3.msk.msra.mxu1 %vm88_vm1, %v81_v6  ;;  %v36_v28 = vadd.f32 %v35_v22, %v34_v14  ;;  %v316_v29 = vrot.slane %v315_v23, 4  ;;  %v456_v38 = vadd.f32 %v455_v35, %v454_v34 }
   0xa   :  { %719 = vmatprep.subr.bf16.mxu1 %v845_v17  ;;  %701 = vmatpush3.msk.msra.mxu0 %vm88_vm1, %v642_v9 }
   0xb   :  { %v37_v36 = vrot.slane %v36_v28, 2  ;;  %v317_v37 = vadd.f32 %v316_v29, %v315_v23  ;;  %727 = vmatprep.subr.bf16.mxu0 %v856_v24 }
   0xc   :  { %10 = vsyncpa [#allocation3], 0  ;;  %v175_v39 = vrot.slane %v174_v33, 4  ;;  %v457_v42 = vrot.slane %v456_v38, 4 }
   0xd   :  { %v38_v40 = vadd.f32 %v37_v36, %v36_v28  ;;  %v318_v41 = vrot.slane %v317_v37, 2 }
   0xe   :  { %v176_v43 = vadd.f32 %v175_v39, %v174_v33  ;;  %v458_v46 = vadd.f32 %v457_v42, %v456_v38 }
   0xf   :  { %v39_v44 = vrot.slane %v38_v40, 1  ;;  %v319_v45 = vadd.f32 %v318_v41, %v317_v37 }
  0x10   :  { %v177_v47 = vrot.slane %v176_v43, 2  ;;  %v459_v50 = vrot.slane %v458_v46, 2 }
  0x11   :  { %v40_v48 = vadd.f32 %v39_v44, %v38_v40  ;;  %v320_v49 = vrot.slane %v319_v45, 1 }
  0x12   :  { %v178_v51 = vadd.f32 %v177_v47, %v176_v43  ;;  %v460_v54 = vadd.f32 %v459_v50, %v458_v46 }
  0x13   :  { %v42_v52 = vmul.f32 0.0625, %v40_v48  ;;  %v321_v53 = vadd.f32 %v320_v49, %v319_v45 }
  0x14   :  { %v179_v55 = vrot.slane %v178_v51, 1  ;;  %v461_v59 = vrot.slane %v460_v54, 1 }
  0x15   :  { %v878_v56 = vsub.f32 %v29_v7, %v42_v52  ;;  %v880_v57 = vsub.f32 %v30_v8, %v42_v52  ;;  %v322_v58 = vmul.f32 0.0625, %v321_v53 }
  0x16   :  { %v180_v60 = vadd.f32 %v179_v55, %v178_v51  ;;  %v462_v2 = vadd.f32 %v461_v59, %v460_v54 }
  0x17   :  { %v45_v61 = vmul.f32 %v878_v56, %v878_v56  ;;  %v46_v62 = vmul.f32 %v880_v57, %v880_v57  ;;  %v886_v63 = vsub.f32 %v634_v15, %v322_v58  ;;  %v888_v0 = vsub.f32 %v635_v16, %v322_v58 }
  0x18   :  { %v181_v1 = vmul.f32 0.0625, %v180_v60  ;;  %v463_v10 = vmul.f32 0.0625, %v462_v2 }
  0x19   :  { %v47_v3 = vsel %vm31_vm0, %v45_v61, 0.0  ;;  %v48_v4 = vsel %vm31_vm0, %v46_v62, 0.0  ;;  %v325_v5 = vmul.f32 %v886_v63, %v886_v63  ;;  %v326_v6 = vmul.f32 %v888_v0, %v888_v0 }
  0x1a   :  { %v49_v7 = vadd.f32 %v48_v4, %v47_v3  ;;  %v896_v8 = vsub.f32 %v622_v25, %v181_v1  ;;  %v898_v9 = vsub.f32 %v623_v26, %v181_v1  ;;  %v906_v18 = vsub.f32 %v646_v31, %v463_v10  ;;  %v617_v1 = vld [vmem:[%s986_s1] ss:$0 sm:$0xff] }
  0x1b   :  { %v327_v11 = vsel %vm31_vm0, %v325_v5, 0.0  ;;  %v328_v12 = vsel %vm31_vm0, %v326_v6, 0.0  ;;  %v908_v19 = vsub.f32 %v647_v32, %v463_v10  ;;  %v618_v5 = vld [vmem:[%s987_s2] ss:$0 sm:$0xff]  ;;  %v637_v6 = vld [vmem:[%s986_s1 + $0x2] ss:$0 sm:$0xff] }
  0x1c   :  { %v50_v13 = vrot.slane %v49_v7, 4  ;;  %v329_v14 = vadd.f32 %v328_v12, %v327_v11  ;;  %v184_v15 = vmul.f32 %v896_v8, %v896_v8  ;;  %v185_v16 = vmul.f32 %v898_v9, %v898_v9 }
  0x1d   :  { %v466_v26 = vmul.f32 %v906_v18, %v906_v18  ;;  %v467_v27 = vmul.f32 %v908_v19, %v908_v19 }
  0x1e   :  { %v51_v20 = vadd.f32 %v50_v13, %v49_v7  ;;  %v330_v21 = vrot.slane %v329_v14, 4  ;;  %v186_v22 = vsel %vm31_vm0, %v184_v15, 0.0  ;;  %v187_v23 = vsel %vm31_vm0, %v185_v16, 0.0 }
  0x1f   :  { %v188_v25 = vadd.f32 %v187_v23, %v186_v22  ;;  %v468_v31 = vsel %vm31_vm0, %v466_v26, 0.0  ;;  %v469_v32 = vsel %vm31_vm0, %v467_v27, 0.0  ;;  %v630_v23 = vld [vmem:[%s988_s3 + $0x28] sm:$0xf] }
  0x20   :  { %v52_v28 = vrot.slane %v51_v20, 2  ;;  %v331_v29 = vadd.f32 %v330_v21, %v329_v14  ;;  %v470_v35 = vadd.f32 %v469_v32, %v468_v31  ;;  %v651_v32 = vld [vmem:[%s987_s2 + $0x3] ss:$0 sm:$0xff] }
  0x21   :  { %v189_v30 = vrot.slane %v188_v25, 4 }
  0x22   :  { %v53_v33 = vadd.f32 %v52_v28, %v51_v20  ;;  %v332_v34 = vrot.slane %v331_v29, 2  ;;  %v471_v39 = vrot.slane %v470_v35, 4  ;;  %v625_v20 = vld [vmem:[%s986_s1 + $0x1] ss:$0 sm:$0xff] }
  0x23   :  { %v190_v36 = vadd.f32 %v189_v30, %v188_v25  ;;  %v627_v25 = vld [vmem:[%s987_s2 + $0x1] ss:$0 sm:$0xff] }
  0x24   :  { %v54_v37 = vrot.slane %v53_v33, 1  ;;  %v333_v38 = vadd.f32 %v332_v34, %v331_v29  ;;  %v472_v43 = vadd.f32 %v471_v39, %v470_v35 }
  0x25   :  { %v191_v40 = vrot.slane %v190_v36, 2 }
  0x26   :  { %v55_v41 = vadd.f32 %v54_v37, %v53_v33  ;;  %v334_v42 = vrot.slane %v333_v38, 1  ;;  %v473_v47 = vrot.slane %v472_v43, 2 }
  0x27   :  { %v192_v44 = vadd.f32 %v191_v40, %v190_v36 }
  0x28   :  { %v56_v45 = vmul.f32 0.0625, %v55_v41  ;;  %v335_v46 = vadd.f32 %v334_v42, %v333_v38  ;;  %v474_v51 = vadd.f32 %v473_v47, %v472_v43 }
  0x29   :  { %v193_v48 = vrot.slane %v192_v44, 1 }
  0x2a   :  { %v57_v49 = vadd.f32 1e-05, %v56_v45  ;;  %v336_v50 = vmul.f32 0.0625, %v335_v46  ;;  %v475_v54 = vrot.slane %v474_v51, 1 }
  0x2b   :  { %v194_v52 = vadd.f32 %v193_v48, %v192_v44 }
  0x2c   :  { %741 = vrsqrt.f32 %v57_v49  ;;  %v337_v53 = vadd.f32 1e-05, %v336_v50  ;;  %v476_v58 = vadd.f32 %v475_v54, %v474_v51 }
  0x2d   :  { %v195_v55 = vmul.f32 0.0625, %v194_v52 }
  0x2e   :  { %743 = vrsqrt.f32 %v337_v53  ;;  %v477_v60 = vmul.f32 0.0625, %v476_v58 }
  0x2f   :  { %v196_v59 = vadd.f32 1e-05, %v195_v55 }
  0x30   :  { %v478_v61 = vadd.f32 1e-05, %v477_v60 }
  0x31   :  { %745 = vrsqrt.f32 %v196_v59 }
  0x32   :  { %747 = vrsqrt.f32 %v478_v61 }
  0x36   :  { %v742_v62 = vpop.eup %741 }
  0x37   :  { %v59_v2 = vmul.f32 %v742_v62, %v878_v56  ;;  %v60_v3 = vmul.f32 %v742_v62, %v880_v57  ;;  %v639_v56 = vld [vmem:[%s987_s2 + $0x2] ss:$0 sm:$0xff] }
  0x38   :  { %v744_v4 = vpop.eup %743 }
  0x39   :  { %v68_v7 = vmul.f32 %v617_v1, %v59_v2  ;;  %v69_v10 = vmul.f32 %v617_v1, %v60_v3  ;;  %v339_v11 = vmul.f32 %v744_v4, %v886_v63  ;;  %v340_v12 = vmul.f32 %v744_v4, %v888_v0 }
  0x3b   :  { %v746_v57 = vpop.eup %745  ;;  %v77_v13 = vadd.f32 %v618_v5, %v68_v7  ;;  %v78_v14 = vadd.f32 %v618_v5, %v69_v10  ;;  %v349_v15 = vmul.f32 %v637_v6, %v339_v11  ;;  %v350_v16 = vmul.f32 %v637_v6, %v340_v12 }
  0x3c   :  { %v198_v21 = vmul.f32 %v746_v57, %v896_v8  ;;  %v199_v22 = vmul.f32 %v746_v57, %v898_v9  ;;  %v748_v26 = vpop.eup %747  ;;  %v649_v8 = vld [vmem:[%s986_s1 + $0x3] ss:$0 sm:$0xff]  ;;  %v654_v9 = vld [vmem:[%s988_s3 + $0x58] sm:$0xf]  ;;  %s773_s3 = smov [#allocation2]  }
  0x3d   :  { %684 = vmatprep.mubr.msk.f32.mxu1 %vm31_vm0, %v77_v13  ;;  %v359_v63 = vadd.f32 %v639_v56, %v349_v15  ;;  %v360_v0 = vadd.f32 %v639_v56, %v350_v16  ;;  %v480_v29 = vmul.f32 %v748_v26, %v906_v18  ;;  %v481_v30 = vmul.f32 %v748_v26, %v908_v19  ;;  %s605_s23 = sshll.u32 %s773_s3, 4  ;;  %s606_s23 = int_to_ptr.vmem [resolvable:$true] %s605_s23 }
  0x3e   :  { %685 = vmatmul.mubr.msk.f32.vlgmr.msra.gmra.mrb[0].mxu1 %vm31_vm0, %v78_v14  ;;  %v208_v27 = vmul.f32 %v625_v20, %v198_v21  ;;  %v209_v28 = vmul.f32 %v625_v20, %v199_v22  ;;  %p754_p1 = scmp.lt.s32.totalorder %s606_s23, %s606_s23 }
  0x3f   :  { %702 = vmatprep.mubr.msk.f32.mxu0 %vm31_vm0, %v359_v63  ;;  %721 = vmatpush3.bf16.msra.mxu1 %v845_v17  ;;  %v490_v17 = vmul.f32 %v649_v8, %v480_v29  ;;  %v491_v33 = vmul.f32 %v649_v8, %v481_v30 }
  0x40   :  { %703 = vmatmul.mubr.msk.f32.vlgmr.msra.gmra.mrb[0].mxu0 %vm31_vm0, %v360_v0  ;;  %691 = vmatprep.subr.msk.mxu1 %vm88_vm1, %v630_v23  ;;  %v218_v31 = vadd.f32 %v627_v25, %v208_v27  ;;  %v219_v34 = vadd.f32 %v627_v25, %v209_v28 }
  0x41   :  { %729 = vmatpush3.bf16.msra.mxu0 %v856_v24  ;;  %v500_v18 = vadd.f32 %v651_v32, %v490_v17  ;;  %v501_v19 = vadd.f32 %v651_v32, %v491_v33  ;;  %v616_v24 = vld [vmem:[%s989_s4] ss:$0 sm:$0xff]  ;;  %s749_s4 = scalar_lea.vmem %s606_s23, 256 }
  0x42   :  { %709 = vmatprep.subr.msk.mxu0 %vm88_vm1, %v654_v9  ;;  %693 = vmatprep.mubr.msk.f32.mxu1 %vm31_vm0, %v218_v31  ;;  %p750_p0 = scmp.ne.s32.totalorder %s606_s23, %s749_s4  ;;  %p755_p2 = scmp.lt.s32.totalorder %s749_s4, %s749_s4 }
  0x43   :  { %692 = vmatpush3.msk.msra.mxu1 %vm88_vm1, %v630_v23  ;;  %711 = vmatprep.mubr.msk.f32.mxu0 %vm31_vm0, %v500_v18 }
  0x44   :  { %p756_p3 = por %p755_p2, %p754_p1 }
  0x45   :  { %710 = vmatpush3.msk.msra.mxu0 %vm88_vm1, %v654_v9 }
  0x46   :  { %694 = vmatmul.mubr.msk.f32.vlgmr.msra.gmra.mrb[0].mxu1 %vm31_vm0, %v219_v34  ;;  %p757_p4 = pnand %p756_p3, %p750_p0 }
  0x48   :  { %712 = vmatmul.mubr.msk.f32.vlgmr.msra.gmra.mrb[0].mxu0 %vm31_vm0, %v501_v19 }
 0x119   :  { %v695_v35 = vpop.f32.mrb[0].mxu1 }
 0x11a   :  { %v730_v36 = vadd.f32 %v695_v35, %v616_v24  ;;  %v299_v37 = vpop.f32.mrb[1].mxu1 }
 0x11b   :  { %v713_v38 = vpop.f32.mrb[0].mxu0  ;;  %v732_v39 = vadd.f32 %v616_v24, %v299_v37 }
 0x11c   :  { %v731_v40 = vadd.f32 %v730_v36, %v713_v38  ;;  %v581_v41 = vpop.f32.mrb[1].mxu0 }
 0x11d   :  { %v733_v42 = vadd.f32 %v732_v39, %v581_v41 }
 0x11e   :  { %vm593_vm2 = vcmp.gt.f32.partialorder %v731_v40, 0.0  ;;  %v595_v43 = vmul.f32 0.01, %v731_v40 }
 0x11f   :  { %vm592_vm3 = vcmp.gt.f32.partialorder %v733_v42, 0.0  ;;  %v594_v44 = vmul.f32 0.01, %v733_v42 }
 0x120   :  { %v597_v45 = vsel %vm593_vm2, %v731_v40, %v595_v43 }
 0x121   :  { %599 = vst [vmem:[#allocation2 + $0x8] sm:$0xff] %v597_v45  ;;  %v596_v46 = vsel %vm592_vm3, %v733_v42, %v594_v44 }
 0x122   :  { %598 = vst [vmem:[#allocation2] sm:$0xff] %v596_v46 }
 0x123   :  { %760 = shalt.err (!%p757_p4)
}
 0x124   :  { %s761_s26 = scalar_lea.hbm %s990_s5, 256 }
 0x125   :  { %p762_p5 = scmp.ne.s32.totalorder %s990_s5, %s761_s26  ;;  %p765_p6 = scmp.lt.u32.totalorder %s761_s26, %s990_s5 }
 0x127   :  { %p767_p7 = pnand %p765_p6, %p762_p5 }
 0x129   :  { %770 = shalt.err (!%p767_p7)
}
 0x12a   :  { %s774_s30 = smov 128   ;;  %s775_s6 = smov 8  }
 0x12b   :  { %611 = dma.vmem_to_hbm [thread:$0]  %s606_s23, 256, %s990_s5, [#allocation3], %s774_s30, %s774_s30, %s775_s6  }
 0x12c   :  { %771 = dma.done.wait [#allocation3], 256  }
 0x12d   :  { %772 = vsyncadd [#allocation3], 4294967040 }
 0x12e   :  { %615 = vsyncpa [#allocation3], 1 }

</bundles_post_ra>
